<compile_context>
chip_gen: v5e
topology: v5e:2x2
jax: 0.10.0
libtpu: 0.0.40
codegen_flags: <defaults>
</compile_context>

<pallas_src>
import math
import functools

import numpy as np
import jax
import jax.numpy as jnp
from jax.experimental import pallas as pl
from jax.experimental.pallas import tpu as pltpu


_SQRT_HALF = 1.0 / math.sqrt(2.0)


def _gelu(x, approximate):
    if approximate:
        # tanh-approx GELU -> exp/tanh run on the EUP slot (hides under MXU).
        return jax.nn.gelu(x, approximate=True)
    # nn.GELU() default: exact (erf-based) GELU.
    return 0.5 * x * (1.0 + jax.lax.erf(x * _SQRT_HALF))


# ----------------------------------------------------------------------------
# Kernel
# ----------------------------------------------------------------------------
def mlp_block_kernel(x_ref, w1_ref, b1_ref, w2_ref, b2_ref, o_ref, acc_ref,
                     *, compute_dtype, precision, approximate_gelu):
    k = pl.program_id(1)
    nk = pl.num_programs(1)

    @pl.when(k == 0)
    def _():
        acc_ref[...] = jnp.zeros_like(acc_ref)

    x = x_ref[...].astype(compute_dtype)                       # (TM, P)
    # First matmul on the MXU, f32 accumulation.
    h = jnp.dot(x, w1_ref[...].astype(compute_dtype),
                preferred_element_type=jnp.float32,
                precision=precision)                           # (TM, TH) f32
    h = h + b1_ref[...].astype(jnp.float32)                    # broadcast (1, TH)
    h = _gelu(h, approximate_gelu)
    # Second matmul on the MXU, accumulate into the f32 scratch.
    acc_ref[...] += jnp.dot(h.astype(compute_dtype),
                            w2_ref[...].astype(compute_dtype),
                            preferred_element_type=jnp.float32,
                            precision=precision)               # (TM, P) f32

    @pl.when(k == nk - 1)
    def _():
        o_ref[...] = (acc_ref[...]
                      + b2_ref[...].astype(jnp.float32)).astype(o_ref.dtype)


# ----------------------------------------------------------------------------
# Tile / VMEM budgeting helpers
# ----------------------------------------------------------------------------
def _round_up(x, n):
    return ((x + n - 1) // n) * n


def _vmem_budget_bytes():
    """Per-generation VMEM budget with headroom for Mosaic internal scratch."""
    try:
        cap = int(pltpu.get_tpu_info().vmem_capacity_bytes)
    except Exception:
        cap = 64 << 20  # conservative: v7x per-TensorCore VMEM
    # ~48 MiB on v7x (64 MiB physical), ~96 MiB on v5e/v6e (128 MiB physical).
    return max(16 << 20, min(cap - (16 << 20), (cap * 3) // 4))


def _footprint_bytes(tm, th, p, nh, x_bytes, w_bytes):
    """Approximate VMEM footprint of one pipelined step."""
    wbuf = 1 if nh == 1 else 2          # weights single-buffered when resident
    return (
        2 * tm * p * x_bytes            # x tile (double-buffered)
        + 2 * tm * p * x_bytes          # out tile (double-buffered)
        + wbuf * p * th * w_bytes       # W1 tile(s)
        + wbuf * th * p * w_bytes       # W2 tile(s)
        + wbuf * th * 4 + p * 4         # biases (f32)
        + tm * p * 4                    # f32 accumulator scratch
        + tm * th * (4 + w_bytes)       # f32 hidden intermediate + cast copy
    )


def _largest_divisor_tile(m, cap, step):
    """Largest multiple of `step` that divides m and is <= cap (0 if none)."""
    best = 0
    t = step
    while t <= cap:
        if m % t == 0:
            best = t
        t += step
    return best


def _choose_tm(m, max_tm):
    """Row tile: MXU-aligned, prefers exact divisors of M, >=2 tiles when big."""
    max_tm = min(max_tm, 2048)
    if m <= max_tm:
        if m >= 512:
            # Megacore: try to split into >=2 tiles with an exact divisor.
            t = (_largest_divisor_tile(m, m // 2, 256)
                 or _largest_divisor_tile(m, m // 2, 8))
            if t >= 128:
                return t
        return max(8, _round_up(m, 8))
    t = _largest_divisor_tile(m, max_tm, 256)
    if t:
        return t
    t = _largest_divisor_tile(m, max_tm, 8)
    if t >= 128:
        return t
    # No good divisor: aligned tile + small padded tail.
    return max_tm


def _choose_tiles(m, patch, hidden, x_bytes, w_bytes, budget, hidden_tile):
    tm_probe = min(256, max(8, _round_up(m, 8)))
    if hidden_tile is not None:
        th = int(hidden_tile)
        assert th == hidden or th % 128 == 0, "hidden_tile must be 128-aligned"
    elif _footprint_bytes(tm_probe, hidden, patch, 1, x_bytes, w_bytes) <= budget:
        th = hidden                     # full weight residency (common case)
    else:
        # Tile hidden_dim: largest multiple of 128 dividing it that fits.
        th = 0
        t = (hidden // 128) * 128
        while t >= 128:
            if hidden % t == 0 and _footprint_bytes(
                    tm_probe, t, patch, 2, x_bytes, w_bytes) <= budget:
                th = t
                break
            t -= 128
        if th == 0:
            th = 128                    # last resort (hidden gets zero-padded)

    h_pad = _round_up(hidden, th)
    nh = h_pad // th

    max_tm = 128
    for cand in (2048, 1024, 512, 256, 128):
        if _footprint_bytes(cand, th, patch, nh, x_bytes, w_bytes) <= budget:
            max_tm = cand
            break
    tm = _choose_tm(m, max_tm)
    return tm, th


def _weight_spec(shape, index_map, single_buffer):
    """Single-buffer tiles whose block index never changes (halves resident
    weight VMEM); silently fall back if pipeline_mode is unsupported."""
    if single_buffer:
        try:
            return pl.BlockSpec(shape, index_map, pipeline_mode=pl.Buffered(1))
        except (TypeError, AttributeError):
            pass
    return pl.BlockSpec(shape, index_map)


# ----------------------------------------------------------------------------
# Wrapper
# ----------------------------------------------------------------------------
@functools.partial(jax.jit,
                   static_argnames=("compute_dtype", "approximate_gelu",
                                    "hidden_tile"))
def mlp_block(x, w1, b1, w2, b2, *, compute_dtype=jnp.bfloat16,
              approximate_gelu=False, hidden_tile=None):
    """x: (..., patch_dim); returns same shape.

    Weights: w1 (patch_dim, hidden_dim), w2 (hidden_dim, patch_dim)
    (transposed relative to torch nn.Linear.weight).

    compute_dtype=bf16 (default): bf16 MXU operands, f32 accumulation.
    compute_dtype=f32: precision=HIGHEST -> exact float32 (torch) parity.
    """
    orig_shape = x.shape
    patch_dim = x.shape[-1]
    hidden_dim = w1.shape[1]
    m = 1
    for d in x.shape[:-1]:
        m *= d

    out_dtype = x.dtype
    compute_dtype = np.dtype(compute_dtype)
    precision = (jax.lax.Precision.HIGHEST
                 if compute_dtype == np.dtype(np.float32) else None)

    # Cast weights once in the wrapper (halves weight DMA + resident VMEM for
    # bf16); biases stay f32 and are added to the f32 accumulators.
    w1 = w1.astype(compute_dtype)
    w2 = w2.astype(compute_dtype)
    b1 = b1.astype(jnp.float32)
    b2 = b2.astype(jnp.float32)

    x_bytes = np.dtype(out_dtype).itemsize
    w_bytes = compute_dtype.itemsize

    budget = _vmem_budget_bytes()
    tm, th = _choose_tiles(m, patch_dim, hidden_dim, x_bytes, w_bytes,
                           budget, hidden_tile)

    # Zero-pad hidden_dim if the hidden tile does not divide it (exact math:
    # padded columns of W1/b1 produce gelu(0)=0 rows that contribute nothing).
    h_pad = _round_up(hidden_dim, th)
    if h_pad != hidden_dim:
        w1 = jnp.pad(w1, ((0, 0), (0, h_pad - hidden_dim)))
        b1 = jnp.pad(b1, (0, h_pad - hidden_dim))
        w2 = jnp.pad(w2, ((0, h_pad - hidden_dim), (0, 0)))

    x2d = x.reshape(m, patch_dim)
    m_pad = _round_up(m, tm)
    if m_pad != m:
        # TODO(synk): handle the ragged row tail in-kernel (masked store) to
        # drop this pad/slice HBM round trip; tile selection above makes this
        # path rare (only when no aligned divisor of M fits the VMEM budget).
        x2d = jnp.pad(x2d, ((0, m_pad - m), (0, 0)))

    b1_2d = b1.reshape(1, h_pad)
    b2_2d = b2.reshape(1, patch_dim)

    n_m = m_pad // tm
    n_h = h_pad // th
    weights_resident = (n_h == 1)

    kern = functools.partial(mlp_block_kernel,
                             compute_dtype=compute_dtype,
                             precision=precision,
                             approximate_gelu=approximate_gelu)

    # TODO(synk): when patch_dim < 128, fold rows into a lane-dense (>=128)
    # last axis for the x/out blocks to avoid masked vst.msk partial stores.
    out2d = pl.pallas_call(
        kern,
        out_shape=jax.ShapeDtypeStruct((m_pad, patch_dim), out_dtype),
        grid_spec=pltpu.PrefetchScalarGridSpec(
            num_scalar_prefetch=0,
            grid=(n_m, n_h),
            in_specs=[
                # x: one (TM, P) row tile, constant across the hidden axis.
                pl.BlockSpec((tm, patch_dim), lambda i, k: (i, 0)),
                # Weights / biases: VMEM-resident (single-buffered) when the
                # hidden axis has a single step, tiled over k otherwise.
                _weight_spec((patch_dim, th), lambda i, k: (0, k),
                             weights_resident),
                _weight_spec((1, th), lambda i, k: (0, k), weights_resident),
                _weight_spec((th, patch_dim), lambda i, k: (k, 0),
                             weights_resident),
                _weight_spec((1, patch_dim), lambda i, k: (0, 0), True),
            ],
            out_specs=pl.BlockSpec((tm, patch_dim), lambda i, k: (i, 0)),
            scratch_shapes=[pltpu.VMEM((tm, patch_dim), jnp.float32)],
        ),
        compiler_params=pltpu.CompilerParams(
            dimension_semantics=("parallel", "arbitrary"),
            vmem_limit_bytes=int(budget),
        ),
    )(x2d, w1, b1_2d, w2, b2_2d)

    if m_pad != m:
        out2d = out2d[:m]
    return out2d.reshape(orig_shape)


# ----------------------------------------------------------------------------
# Reference / params / test
# ----------------------------------------------------------------------------
def _ref_mlp(x, w1, b1, w2, b2):
    hi = jax.lax.Precision.HIGHEST
    h = jnp.dot(x, w1, precision=hi) + b1
    h = _gelu(h, False)
    return jnp.dot(h, w2, precision=hi) + b2


def init_params(key, patch_dim, hidden_dim, dtype=jnp.float32):
    """Deterministic init mimicking nn.Linear's default U(-1/sqrt(fan_in), ...)."""
    k1, k2, k3, k4 = jax.random.split(key, 4)
    bound1 = 1.0 / math.sqrt(patch_dim)
    bound2 = 1.0 / math.sqrt(hidden_dim)
    # Stored transposed relative to torch: (in_features, out_features).
    w1 = jax.random.uniform(k1, (patch_dim, hidden_dim), dtype, -bound1, bound1)
    b1 = jax.random.uniform(k2, (hidden_dim,), dtype, -bound1, bound1)
    w2 = jax.random.uniform(k3, (hidden_dim, patch_dim), dtype, -bound2, bound2)
    b2 = jax.random.uniform(k4, (patch_dim,), dtype, -bound2, bound2)
    return w1, b1, w2, b2


if __name__ == "__main__":
    batch, seq, patch_dim, hidden_dim = 2, 8, 16, 32

    key = jax.random.PRNGKey(0)
    kx, kp = jax.random.split(key)
    x = jax.random.normal(kx, (batch, seq, patch_dim), jnp.float32)
    w1, b1, w2, b2 = init_params(kp, patch_dim, hidden_dim)
    ref = _ref_mlp(x, w1, b1, w2, b2)

    # 1) Fast path: bf16 MXU operands, f32 accumulation (default).
    out_bf16 = jax.block_until_ready(
        mlp_block(x, w1, b1, w2, b2, compute_dtype=jnp.bfloat16))
    assert out_bf16.shape == x.shape and out_bf16.dtype == x.dtype
    assert jnp.allclose(out_bf16, ref, atol=3e-2, rtol=3e-2)

    # 2) Exact-parity path: f32 operands with precision=HIGHEST.
    out_f32 = jax.block_until_ready(
        mlp_block(x, w1, b1, w2, b2, compute_dtype=jnp.float32))
    assert jnp.allclose(out_f32, ref, atol=1e-5, rtol=1e-5)

    # 3) Hidden-dim-tiled accumulation path (forced), verifies the k-loop.
    w1b, b1b, w2b, b2b = init_params(jax.random.PRNGKey(1), patch_dim, 256)
    refb = _ref_mlp(x, w1b, b1b, w2b, b2b)
    outb = jax.block_until_ready(
        mlp_block(x, w1b, b1b, w2b, b2b, compute_dtype=jnp.float32,
                  hidden_tile=128))
    assert jnp.allclose(outb, refb, atol=1e-5, rtol=1e-5)

    print("KERNEL_OK")
</pallas_src>

<mosaic_0001>
module attributes {stable_mosaic.version = 11 : i64} {
  func.func @mlp_block_kernel(%arg0: i32, %arg1: i32, %arg2: memref<16x16xf32, #tpu.memory_space<vmem>>, %arg3: memref<16x32xbf16, #tpu.memory_space<vmem>>, %arg4: memref<1x32xf32, #tpu.memory_space<vmem>>, %arg5: memref<32x16xbf16, #tpu.memory_space<vmem>>, %arg6: memref<1x16xf32, #tpu.memory_space<vmem>>, %arg7: memref<16x16xf32, #tpu.memory_space<vmem>>, %arg8: memref<16x16xf32, #tpu.memory_space<vmem>>) attributes {dimension_semantics = [#tpu.dimension_semantics<parallel>, #tpu.dimension_semantics<arbitrary>], iteration_bounds = array<i64: 1, 1>, scalar_prefetch = 0 : i64, scratch_operands = 1 : i64, tpu.core_type = #tpu.core_type<tc>, window_params = [{transform_indices = @transform_0, window_bounds = array<i64: 16, 16>}, {pipeline_mode = #tpu.pipeline_mode<synchronous>, transform_indices = @transform_1, window_bounds = array<i64: 16, 32>}, {pipeline_mode = #tpu.pipeline_mode<synchronous>, transform_indices = @transform_2, window_bounds = array<i64: 1, 32>}, {pipeline_mode = #tpu.pipeline_mode<synchronous>, transform_indices = @transform_3, window_bounds = array<i64: 32, 16>}, {pipeline_mode = #tpu.pipeline_mode<synchronous>, transform_indices = @transform_4, window_bounds = array<i64: 1, 16>}, {transform_indices = @transform_5, window_bounds = array<i64: 16, 16>}]} {
    %c0_i32 = arith.constant 0 : i32
    %0 = arith.cmpi eq, %arg1, %c0_i32 : i32
    %1 = arith.extui %0 : i1 to i32
    %c0_i32_0 = arith.constant 0 : i32
    %2 = arith.cmpi ne, %1, %c0_i32_0 : i32
    scf.if %2 {
      %cst_18 = arith.constant 0.000000e+00 : f32
      %27 = vector.broadcast %cst_18 : f32 to vector<16x16xf32>
      %c0_19 = arith.constant 0 : index
      %c0_20 = arith.constant 0 : index
      %28 = vector.load %arg8[%c0_19, %c0_20] : memref<16x16xf32, #tpu.memory_space<vmem>>, vector<16x16xf32>
      tpu.vector_store %arg8[%c0_19, %c0_20], %27 {strides = array<i32>} : memref<16x16xf32, #tpu.memory_space<vmem>>, vector<16x16xf32>,
    } else {
    }
    %c0 = arith.constant 0 : index
    %c0_1 = arith.constant 0 : index
    %3 = vector.load %arg2[%c0, %c0_1] : memref<16x16xf32, #tpu.memory_space<vmem>>, vector<16x16xf32>
    %4 = arith.truncf %3 : vector<16x16xf32> to vector<16x16xbf16>
    %c0_2 = arith.constant 0 : index
    %c0_3 = arith.constant 0 : index
    %5 = vector.load %arg3[%c0_2, %c0_3] : memref<16x32xbf16, #tpu.memory_space<vmem>>, vector<16x32xbf16>
    %cst = arith.constant dense<0.000000e+00> : vector<16x32xf32>
    %6 = tpu.matmul %4, %5, %cst {dimension_numbers = #tpu.dot_dimension_numbers<[1], [0], [0], [1], [0, 0, 1, 1], [], []>} : vector<16x16xbf16>, vector<16x32xbf16>, vector<16x32xf32> -> vector<16x32xf32>
    %c0_4 = arith.constant 0 : index
    %c0_5 = arith.constant 0 : index
    %7 = vector.load %arg4[%c0_4, %c0_5] : memref<1x32xf32, #tpu.memory_space<vmem>>, vector<1x32xf32>
    %8 = vector.broadcast %7 : vector<1x32xf32> to vector<16x32xf32>
    %9 = arith.addf %6, %8 : vector<16x32xf32>
    %cst_6 = arith.constant 5.000000e-01 : f32
    %10 = vector.broadcast %cst_6 : f32 to vector<16x32xf32>
    %11 = arith.mulf %10, %9 : vector<16x32xf32>
    %cst_7 = arith.constant 0.707106769 : f32
    %12 = vector.broadcast %cst_7 : f32 to vector<16x32xf32>
    %13 = arith.mulf %9, %12 : vector<16x32xf32>
    %14 = math.erf %13 : vector<16x32xf32>
    %cst_8 = arith.constant 1.000000e+00 : f32
    %15 = vector.broadcast %cst_8 : f32 to vector<16x32xf32>
    %16 = arith.addf %15, %14 : vector<16x32xf32>
    %17 = arith.mulf %11, %16 : vector<16x32xf32>
    %c0_9 = arith.constant 0 : index
    %c0_10 = arith.constant 0 : index
    %18 = vector.load %arg8[%c0_9, %c0_10] : memref<16x16xf32, #tpu.memory_space<vmem>>, vector<16x16xf32>
    %19 = arith.truncf %17 : vector<16x32xf32> to vector<16x32xbf16>
    %c0_11 = arith.constant 0 : index
    %c0_12 = arith.constant 0 : index
    %20 = vector.load %arg5[%c0_11, %c0_12] : memref<32x16xbf16, #tpu.memory_space<vmem>>, vector<32x16xbf16>
    %cst_13 = arith.constant dense<0.000000e+00> : vector<16x16xf32>
    %21 = tpu.matmul %19, %20, %cst_13 {dimension_numbers = #tpu.dot_dimension_numbers<[1], [0], [0], [1], [0, 0, 1, 1], [], []>} : vector<16x32xbf16>, vector<32x16xbf16>, vector<16x16xf32> -> vector<16x16xf32>
    %22 = arith.addf %18, %21 : vector<16x16xf32>
    %c0_14 = arith.constant 0 : index
    %c0_15 = arith.constant 0 : index
    %23 = vector.load %arg8[%c0_14, %c0_15] : memref<16x16xf32, #tpu.memory_space<vmem>>, vector<16x16xf32>
    tpu.vector_store %arg8[%c0_14, %c0_15], %22 {strides = array<i32>} : memref<16x16xf32, #tpu.memory_space<vmem>>, vector<16x16xf32>,
    %c0_i32_16 = arith.constant 0 : i32
    %24 = arith.cmpi eq, %arg1, %c0_i32_16 : i32
    %25 = arith.extui %24 : i1 to i32
    %c0_i32_17 = arith.constant 0 : i32
    %26 = arith.cmpi ne, %25, %c0_i32_17 : i32
    scf.if %26 {
      %c0_18 = arith.constant 0 : index
      %c0_19 = arith.constant 0 : index
      %27 = vector.load %arg8[%c0_18, %c0_19] : memref<16x16xf32, #tpu.memory_space<vmem>>, vector<16x16xf32>
      %c0_20 = arith.constant 0 : index
      %c0_21 = arith.constant 0 : index
      %28 = vector.load %arg6[%c0_20, %c0_21] : memref<1x16xf32, #tpu.memory_space<vmem>>, vector<1x16xf32>
      %29 = vector.broadcast %28 : vector<1x16xf32> to vector<16x16xf32>
      %30 = arith.addf %27, %29 : vector<16x16xf32>
      %c0_22 = arith.constant 0 : index
      %c0_23 = arith.constant 0 : index
      %31 = vector.load %arg7[%c0_22, %c0_23] : memref<16x16xf32, #tpu.memory_space<vmem>>, vector<16x16xf32>
      tpu.vector_store %arg7[%c0_22, %c0_23], %30 {strides = array<i32>} : memref<16x16xf32, #tpu.memory_space<vmem>>, vector<16x16xf32>,
    } else {
    }
    return
  }
  func.func @transform_0(%arg0: i32, %arg1: i32) -> (i32, i32) {
    %c0_i32 = arith.constant 0 : i32
    %c0_i32_0 = arith.constant 0 : i32
    return %arg0, %c0_i32 : i32, i32
  }
  func.func @transform_1(%arg0: i32, %arg1: i32) -> (i32, i32) {
    %c0_i32 = arith.constant 0 : i32
    %c0_i32_0 = arith.constant 0 : i32
    return %c0_i32, %arg1 : i32, i32
  }
  func.func @transform_2(%arg0: i32, %arg1: i32) -> (i32, i32) {
    %c0_i32 = arith.constant 0 : i32
    %c0_i32_0 = arith.constant 0 : i32
    return %c0_i32, %arg1 : i32, i32
  }
  func.func @transform_3(%arg0: i32, %arg1: i32) -> (i32, i32) {
    %c0_i32 = arith.constant 0 : i32
    %c0_i32_0 = arith.constant 0 : i32
    return %arg1, %c0_i32 : i32, i32
  }
  func.func @transform_4(%arg0: i32, %arg1: i32) -> (i32, i32) {
    %c0_i32 = arith.constant 0 : i32
    %c0_i32_0 = arith.constant 0 : i32
    %c0_i32_1 = arith.constant 0 : i32
    return %c0_i32, %c0_i32_0 : i32, i32
  }
  func.func @transform_5(%arg0: i32, %arg1: i32) -> (i32, i32) {
    %c0_i32 = arith.constant 0 : i32
    %c0_i32_0 = arith.constant 0 : i32
    return %arg0, %c0_i32 : i32, i32
  }
}

</mosaic_0001>

<bundles_post_ra>
// kernel: mlp_block.1
= control target key start
LH: loop header
LB: loop body
LE: loop exit
PB: predicated region body
PF: predicated region fallthrough
CT: control target
= control target key end

     0   :  { %s360_s0 = inlined_call_operand.vmem [shape: f32[16,16], index: 0, kind: input, shape index: {}]   ;;  %s361_s1 = inlined_call_operand.vmem [shape: bf16[16,32], index: 1, kind: input, shape index: {}]   ;;  %s362_s2 = inlined_call_operand.vmem [shape: f32[1,32], index: 2, kind: input, shape index: {}]   ;;  %s363_s3 = inlined_call_operand.vmem [shape: bf16[32,16], index: 3, kind: input, shape index: {}]   ;;  %s364_s4 = inlined_call_operand.vmem [shape: f32[1,16], index: 4, kind: input, shape index: {}]   ;;  %s365_s5 = inlined_call_operand.hbm [shape: f32[16,16], index: 5, kind: output, shape index: {}]  }
   0x1   :  { %v238_v0 = vld [vmem:[%s361_s1] sm:$0xff]  ;;  %v30_v2 = vld [vmem:[%s360_s0 + $0x8] sm:$0xff] }
   0x2   :  { %v29_v1 = vld [vmem:[%s360_s0] sm:$0xff] }
   0x3   :  { %v31_v3 = vpack.c.bf16 %v30_v2, %v29_v1 }
   0x4   :  { %10 = vsyncpa [#allocation4], 0  ;;  %55 = vmatpush.bf16.msra.mxu0 %v238_v0  ;;  %vm26_vm0 = vcmask 130048   ;;  %v245_v4 = vld [vmem:[%s362_s2] ss:$0 sm:$0xff]  ;;  %v240_v37 = vld [vmem:[%s363_s3 + $0x8] sm:$0xff] }
   0x5   :  { %179 = vmatpush.bf16.msra.mxu1 %v240_v37  ;;  %v239_v43 = vld [vmem:[%s363_s3] sm:$0xff]  ;;  %v277_v49 = vmov 0.0   ;;  %vm169_vm9 = vcmask 261120   ;;  %s278_s28 = smov [#allocation3]   ;;  %s210_s7 = sshll.u32 %s365_s5, 4  ;;  %s211_s7 = int_to_ptr.hbm [resolvable:$true] %s210_s7 }
   0x6   :  { %27 = vst.msk [vmem:[#allocation2] sm:$0xff] %vm26_vm0, %v277_v49  ;;  %s208_s29 = sshll.u32 %s278_s28, 4  ;;  %s280_s8 = smov 8   ;;  %s209_s29 = int_to_ptr.vmem [resolvable:$true] %s208_s29 }
   0x7   :  { %226 = vmatmul.msk.bf16.vlgmr.msra.gmra.mxu0 %vm26_vm0, %v31_v3  ;;  %28 = vst.msk [vmem:[#allocation2 + $0x8] sm:$0xff] %vm26_vm0, %v277_v49 }
   0x9   :  { %180 = vmatpush.bf16.msra.mxu1 %v239_v43 }
  0x84   :  { %v57_v5 = vpop.f32.mrf.mxu0 }
  0x85   :  { %v324_v6 = vadd.f32 %v245_v4, %v57_v5 }
  0x87   :  { %v327_v7 = vmul.f32 0.70710677, %v324_v6 }
  0x89   :  { %v66_v8 = vmul.f32 %v327_v7, %v327_v7 }
  0x8b   :  { %v67_v9 = vmin.f32 %v66_v8, 16.0 }
  0x8c   :  { %v59_v10 = vpop.f32.mrf.mxu0 }
  0x8d   :  { %v68_v11 = vmul.f32 2.1237322e-06, %v67_v9  ;;  %v79_v12 = vmul.f32 3.8918573e-05, %v67_v9  ;;  %v331_v13 = vadd.f32 %v245_v4, %v59_v10 }
  0x8f   :  { %v69_v14 = vadd.f32 0.00028619796, %v68_v11  ;;  %v80_v15 = vadd.f32 0.001143296, %v79_v12  ;;  %v334_v16 = vmul.f32 0.70710677, %v331_v13 }
  0x91   :  { %v81_v17 = vmul.f32 %v80_v15, %v67_v9  ;;  %v106_v18 = vmul.f32 %v334_v16, %v334_v16  ;;  %v70_v19 = vmul.f32 %v69_v14, %v67_v9 }
  0x93   :  { %v82_v20 = vadd.f32 0.014752088, %v81_v17  ;;  %v107_v21 = vmin.f32 %v106_v18, 16.0  ;;  %v71_v25 = vadd.f32 0.0036580483, %v70_v19 }
  0x95   :  { %v83_v22 = vmul.f32 %v82_v20, %v67_v9  ;;  %v108_v23 = vmul.f32 2.1237322e-06, %v107_v21  ;;  %v119_v24 = vmul.f32 3.8918573e-05, %v107_v21  ;;  %v72_v32 = vmul.f32 %v71_v25, %v67_v9 }
  0x96   :  { %v63_v25 = vmul.f32 0.5, %v331_v13 }
  0x97   :  { %v84_v26 = vadd.f32 0.112945676, %v83_v22  ;;  %v109_v27 = vadd.f32 0.00028619796, %v108_v23  ;;  %v120_v28 = vadd.f32 0.001143296, %v119_v24 }
  0x98   :  { %v73_v39 = vadd.f32 0.05243302, %v72_v32  ;;  %v62_v24 = vmul.f32 0.5, %v324_v6 }
  0x99   :  { %v85_v29 = vmul.f32 %v84_v26, %v67_v9  ;;  %v110_v30 = vmul.f32 %v109_v27, %v107_v21  ;;  %v121_v31 = vmul.f32 %v120_v28, %v107_v21 }
  0x9a   :  { %v74_v45 = vmul.f32 %v73_v39, %v67_v9 }
  0x9b   :  { %v86_v33 = vadd.f32 0.4994258, %v85_v29  ;;  %v111_v34 = vadd.f32 0.0036580483, %v110_v30  ;;  %v122_v35 = vadd.f32 0.014752088, %v121_v31 }
  0x9c   :  { %v75_v51 = vadd.f32 0.18741608, %v74_v45  ;;  %v150_v30 = vld [vmem:[#allocation2] sm:$0xff] }
  0x9d   :  { %v87_v36 = vmul.f32 %v86_v33, %v67_v9  ;;  %v123_v38 = vmul.f32 %v122_v35, %v107_v21  ;;  %v112_v41 = vmul.f32 %v111_v34, %v107_v21  ;;  %v246_v33 = vld [vmem:[%s364_s4] ss:$0 sm:$0xff]  ;;  %s279_s4 = smov 128  }
  0x9e   :  { %v76_v56 = vmul.f32 %v75_v51, %v67_v9 }
  0x9f   :  { %v88_v40 = vadd.f32 1.0, %v87_v36  ;;  %v124_v42 = vadd.f32 0.112945676, %v123_v38  ;;  %v113_v46 = vadd.f32 0.05243302, %v112_v41 }
  0xa0   :  { %v77_v62 = vadd.f32 1.1283791, %v76_v56 }
  0xa1   :  { %247 = vrcp.f32 %v88_v40  ;;  %v125_v44 = vmul.f32 %v124_v42, %v107_v21  ;;  %v114_v53 = vmul.f32 %v113_v46, %v107_v21  ;;  %v100_v58 = vand.u32 2147483648, %v88_v40 }
  0xa2   :  { %v98_v60 = vand.u32 2147483647, %v88_v40  ;;  %vm94_vm2 = vweird.f32 %v88_v40  ;;  %v78_v5 = vmul.f32 %v77_v62, %v327_v7 }
  0xa3   :  { %v126_v47 = vadd.f32 0.4994258, %v125_v44  ;;  %v115_v59 = vadd.f32 0.18741608, %v114_v53  ;;  %v101_v1 = vor.u32 1.1754944e-38, %v100_v58 }
  0xa4   :  { %vm99_vm4 = vcmp.eq.f32.partialorder %v98_v60, 8.507059e+37 }
  0xa5   :  { %v127_v48 = vmul.f32 %v126_v47, %v107_v21  ;;  %v116_v2 = vmul.f32 %v115_v59, %v107_v21 }
  0xa7   :  { %v248_v50 = vpop.eup %247  ;;  %v128_v54 = vadd.f32 1.0, %v127_v48  ;;  %v117_v9 = vadd.f32 1.1283791, %v116_v2 }
  0xa8   :  { %v90_v52 = vmul.f32 %v248_v50, %v88_v40  ;;  %vm95_vm1 = vweird.f32 %v248_v50 }
  0xa9   :  { %249 = vrcp.f32 %v128_v54  ;;  %vm96_vm3 = vmor %vm94_vm2, %vm95_vm1  ;;  %v140_v10 = vand.u32 2147483648, %v128_v54  ;;  %v138_v14 = vand.u32 2147483647, %v128_v54  ;;  %vm134_vm6 = vweird.f32 %v128_v54 }
  0xaa   :  { %v91_v55 = vsub.f32 1.0, %v90_v52  ;;  %v118_v19 = vmul.f32 %v117_v9, %v334_v16  ;;  %v151_v16 = vld [vmem:[#allocation2 + $0x8] sm:$0xff] }
  0xab   :  { %v141_v17 = vor.u32 1.1754944e-38, %v140_v10  ;;  %vm139_vm8 = vcmp.eq.f32.partialorder %v138_v14, 8.507059e+37 }
  0xac   :  { %v92_v57 = vmul.f32 %v248_v50, %v91_v55 }
  0xae   :  { %v93_v61 = vadd.f32 %v248_v50, %v92_v57 }
  0xaf   :  { %v250_v63 = vpop.eup %249 }
  0xb0   :  { %v97_v0 = vsel %vm96_vm3, %v248_v50, %v93_v61  ;;  %v130_v3 = vmul.f32 %v250_v63, %v128_v54  ;;  %vm135_vm5 = vweird.f32 %v250_v63 }
  0xb1   :  { %v102_v4 = vsel %vm99_vm4, %v101_v1, %v97_v0  ;;  %vm136_vm7 = vmor %vm134_vm6, %vm135_vm5 }
  0xb2   :  { %v131_v8 = vsub.f32 1.0, %v130_v3  ;;  %v103_v11 = vmul.f32 %v102_v4, %v78_v5 }
  0xb4   :  { %v132_v12 = vmul.f32 %v250_v63, %v131_v8  ;;  %v227_v18 = vclamps-f32 %v103_v11, 1.0 }
  0xb6   :  { %v133_v15 = vadd.f32 %v250_v63, %v132_v12  ;;  %v146_v23 = vadd.f32 1.0, %v227_v18 }
  0xb8   :  { %v137_v20 = vsel %vm136_vm7, %v250_v63, %v133_v15  ;;  %v148_v27 = vmul.f32 %v146_v23, %v62_v24 }
  0xb9   :  { %v142_v21 = vsel %vm139_vm8, %v141_v17, %v137_v20 }
  0xba   :  { %v143_v22 = vmul.f32 %v142_v21, %v118_v19 }
  0xbc   :  { %v228_v7 = vclamps-f32 %v143_v22, 1.0 }
  0xbe   :  { %v147_v26 = vadd.f32 1.0, %v228_v7 }
  0xc0   :  { %v149_v28 = vmul.f32 %v147_v26, %v63_v25 }
  0xc2   :  { %v152_v29 = vpack.c.bf16 %v149_v28, %v148_v27 }
  0xc4   :  { %237 = vmatmul.msk.bf16.vlgmr.msra.gmra.mxu1 %vm169_vm9, %v152_v29 }
 0x141   :  { %v182_v31 = vpop.f32.mrf.mxu1 }
 0x142   :  { %v187_v32 = vadd.f32 %v182_v31, %v150_v30 }
 0x144   :  { %189 = vst.msk [vmem:[#allocation2] sm:$0xff] %vm26_vm0, %v187_v32 }
 0x149   :  { %v184_v34 = vpop.f32.mrf.mxu1 }
 0x14a   :  { %v188_v6 = vadd.f32 %v184_v34, %v151_v16 }
 0x14b   :  { %v194_v35 = vld [vmem:[#allocation2] sm:$0xff] }
 0x14c   :  { %190 = vst.msk [vmem:[#allocation2 + $0x8] sm:$0xff] %vm26_vm0, %v188_v6  ;;  %v200_v13 = vadd.f32 %v246_v33, %v194_v35 }
 0x14e   :  { %202 = vst.msk [vmem:[#allocation3] sm:$0xff] %vm26_vm0, %v200_v13 }
 0x153   :  { %v195_v36 = vld [vmem:[#allocation2 + $0x8] sm:$0xff] }
 0x154   :  { %v201_v37 = vadd.f32 %v246_v33, %v195_v36 }
 0x156   :  { %203 = vst.msk [vmem:[#allocation3 + $0x8] sm:$0xff] %vm26_vm0, %v201_v37 }
 0x157   :  { %216 = dma.vmem_to_hbm [thread:$0]  %s209_s29, 256, %s211_s7, [#allocation4], %s279_s4, %s279_s4, %s280_s8  }
 0x158   :  { %275 = dma.done.wait [#allocation4], 256  }
 0x159   :  { %276 = vsyncadd [#allocation4], 4294967040 }
 0x15a   :  { %221 = vsyncpa [#allocation4], 1 }

</bundles_post_ra>
